<compile_context>
chip_gen: v7x
topology: tpu7x:2x2x1
jax: 0.10.0
libtpu: 0.0.40
codegen_flags: <defaults>
</compile_context>

<pallas_src>
import jax
import jax.numpy as jnp
import numpy as np
from jax.experimental import pallas as pl
from jax.experimental.pallas import tpu as pltpu

EPS = 1e-5  # nn.BatchNorm2d default eps


# ----------------------------- Pallas kernel --------------------------------
def _bn_relu(acc, r, rt, gamma, beta, n):
    """Training-mode BatchNorm + ReLU on a lane-packed (M, W*C) activation.

    acc   : (M, W*C) f32 conv output (bias omitted -- it cancels under BN)
    r     : (W*C, C) 0/1 matrix folding the W lane groups onto channels
    rt    : (C, W*C) its transpose (per-channel -> lane-packed broadcast)
    gamma, beta : (1, C) BN affine parameters
    n     : samples per channel (N*H*W), python int
    """
    # One matmul for both statistics: rows = [sum, sum-of-squares].
    stats = jnp.concatenate(
        [jnp.sum(acc, axis=0, keepdims=True),
         jnp.sum(acc * acc, axis=0, keepdims=True)], axis=0)        # (2, W*C)
    sq = jnp.dot(stats, r, preferred_element_type=jnp.float32)      # (2, C)
    mu = sq[0:1, :] * (1.0 / n)
    var = jnp.maximum(sq[1:2, :] * (1.0 / n) - mu * mu, 0.0)        # one-pass var
    inv = jax.lax.rsqrt(var + EPS)
    a = gamma * inv                                                 # (1, C)
    b = beta - mu * a                                               # (1, C)
    # One matmul broadcasts both affine vectors back to the lane packing.
    ab = jnp.concatenate([a, b], axis=0)                            # (2, C)
    ab_t = jnp.dot(ab, rt, preferred_element_type=jnp.float32)      # (2, W*C)
    return jnp.maximum(acc * ab_t[0:1, :] + ab_t[1:2, :], 0.0)


def _double_conv_kernel(xp_ref, w1_ref, w2_ref, r1_ref, r1t_ref, r2_ref, r2t_ref,
                        g1_ref, be1_ref, g2_ref, be2_ref, o_ref, h1p_ref):
    # xp_ref : (N, H+2, W*Cin)   bf16, lane-packed rows with a 1-row vertical halo
    # w1_ref : (3*W*Cin, W*Cmid) bf16 fused banded weights (ky taps stacked on K)
    # w2_ref : (3*W*Cmid, W*Cout) bf16 fused banded weights
    # r*/r*t : 0/1 channel fold / broadcast matrices (f32)
    # g*/be* : (1, C) BN gamma / beta
    # o_ref  : (N, H, W*Cout) f32
    # h1p_ref: VMEM scratch (N, H+2, W*Cmid) bf16 (vertical halo for conv2)
    N, Hp, WCin = xp_ref.shape
    H = Hp - 2
    WCmid = w1_ref.shape[1]
    WCout = w2_ref.shape[1]
    M = N * H
    Cmid = r1_ref.shape[1]
    Wd = WCmid // Cmid
    n = M * Wd                     # samples per channel for the batch statistics

    # ---- conv1: ONE fused matmul, K = 3*W*Cin (ky taps + kx band + h-padding) ----
    lhs1 = jnp.concatenate(
        [xp_ref[:, 0:H, :], xp_ref[:, 1:H + 1, :], xp_ref[:, 2:H + 2, :]],
        axis=-1).reshape(M, 3 * WCin)
    acc1 = jnp.dot(lhs1, w1_ref[...], preferred_element_type=jnp.float32)
    h1 = _bn_relu(acc1, r1_ref[...], r1t_ref[...], g1_ref[...], be1_ref[...], n)

    # ---- stage h1 (bf16) with a 1-row vertical halo; zero ONLY the halo rows ----
    zrow = jnp.zeros((N, 1, WCmid), h1p_ref.dtype)
    h1p_ref[:, 0:1, :] = zrow
    h1p_ref[:, H + 1:H + 2, :] = zrow
    h1p_ref[:, 1:H + 1, :] = h1.reshape(N, H, WCmid).astype(h1p_ref.dtype)

    # ---- conv2: ONE fused matmul, K = 3*W*Cmid ----
    # TODO(synk): pack two image rows per matmul row so W*Cmid = 128 lanes and
    # conv2's fused K becomes 384 (full MXU depth, full vregs for acc1/BN1/h1p).
    lhs2 = jnp.concatenate(
        [h1p_ref[:, 0:H, :], h1p_ref[:, 1:H + 1, :], h1p_ref[:, 2:H + 2, :]],
        axis=-1).reshape(M, 3 * WCmid)
    acc2 = jnp.dot(lhs2, w2_ref[...], preferred_element_type=jnp.float32)
    h2 = _bn_relu(acc2, r2_ref[...], r2t_ref[...], g2_ref[...], be2_ref[...], n)

    o_ref[...] = h2.reshape(N, H, WCout)      # lane-dense (last dim = W*Cout)


# ------------------------------- JAX glue ------------------------------------
def upsample_bilinear_2x_align_corners(x):
    """nn.Upsample(scale_factor=2, mode='bilinear', align_corners=True), NCHW."""
    N, C, H, W = x.shape
    Ho, Wo = 2 * H, 2 * W

    def coords(n_in, n_out):
        if n_in == 1:
            i0 = jnp.zeros((n_out,), jnp.int32)
            return i0, i0, jnp.zeros((n_out,), x.dtype)
        src = jnp.arange(n_out, dtype=jnp.float32) * (n_in - 1) / (n_out - 1)
        i0 = jnp.floor(src).astype(jnp.int32)
        i1 = jnp.minimum(i0 + 1, n_in - 1)
        frac = (src - i0.astype(jnp.float32)).astype(x.dtype)
        return i0, i1, frac

    y0, y1, fy = coords(H, Ho)
    ix0, ix1, fx = coords(W, Wo)
    top = x[:, :, y0, :]
    bot = x[:, :, y1, :]
    rows = top * (1.0 - fy)[None, None, :, None] + bot * fy[None, None, :, None]
    left = rows[:, :, :, ix0]
    right = rows[:, :, :, ix1]
    return left * (1.0 - fx)[None, None, None, :] + right * fx[None, None, None, :]


def _fused_banded_conv_weights(w, width):
    """OIHW 3x3 weights -> fused banded matrix of shape (3*width*Cin, width*Cout).

    mat[ky*width*Cin + x_in*Cin + ci, x_out*Cout + co] = w[co, ci, ky, x_in - x_out + 1]
    (zero outside the band), so one lane-packed matmul over the ky-concatenated
    row views implements all 9 taps and the horizontal zero padding of the 3x3
    'same' convolution.  Built once in numpy (no per-call XLA scatters).

    TODO(synk): at production widths cap the band at W_tile*Cin ~ MXU depth and
    loop W tiles (band FLOPs/VMEM grow as W^2 with whole-row packing).
    """
    w = np.asarray(jax.device_get(w), np.float32)
    cout, cin, _, _ = w.shape
    m = np.zeros((3, width, cin, width, cout), np.float32)
    for ky in range(3):
        for kx in range(3):
            blk = w[:, :, ky, kx].T                       # (Cin, Cout)
            for xo in range(width):
                xi = xo + kx - 1
                if 0 <= xi < width:
                    m[ky, xi, :, xo, :] = blk
    return jnp.asarray(m.reshape(3 * width * cin, width * cout), jnp.bfloat16)


def _channel_fold_mats(width, c):
    """0/1 matrices mapping lane-packed (x*c + ch) columns <-> channels."""
    eye = np.eye(c, dtype=np.float32)
    r = np.tile(eye, (width, 1))      # (width*c, c): fold lanes -> channels
    rt = np.tile(eye, (1, width))     # (c, width*c): broadcast channels -> lanes
    return jnp.asarray(r), jnp.asarray(rt)


def precompute_up_params(params, width):
    """One-time prep (per weights / image width): banded MXU weights + BN helpers."""
    cmid = params["w1"].shape[0]
    cout = params["w2"].shape[0]
    r1, r1t = _channel_fold_mats(width, cmid)
    r2, r2t = _channel_fold_mats(width, cout)
    return dict(
        w1f=_fused_banded_conv_weights(params["w1"], width),   # (3*W*Cin,  W*Cmid)
        w2f=_fused_banded_conv_weights(params["w2"], width),   # (3*W*Cmid, W*Cout)
        r1=r1, r1t=r1t, r2=r2, r2t=r2t,
        g1=params["g1"].reshape(1, cmid), be1=params["be1"].reshape(1, cmid),
        g2=params["g2"].reshape(1, cout), be2=params["be2"].reshape(1, cout),
    )


def init_params(key, in_channels, out_channels):
    """Deterministic synthetic parameters; shapes follow Up(in, out, bilinear=True)."""
    mid = in_channels // 2
    ks = jax.random.split(key, 8)
    return dict(
        w1=0.1 * jax.random.normal(ks[0], (mid, in_channels, 3, 3), jnp.float32),   # OIHW
        b1=0.1 * jax.random.normal(ks[1], (mid,), jnp.float32),
        g1=1.0 + 0.1 * jax.random.normal(ks[2], (mid,), jnp.float32),
        be1=0.1 * jax.random.normal(ks[3], (mid,), jnp.float32),
        w2=0.1 * jax.random.normal(ks[4], (out_channels, mid, 3, 3), jnp.float32),  # OIHW
        b2=0.1 * jax.random.normal(ks[5], (out_channels,), jnp.float32),
        g2=1.0 + 0.1 * jax.random.normal(ks[6], (out_channels,), jnp.float32),
        be2=0.1 * jax.random.normal(ks[7], (out_channels,), jnp.float32),
    )


def _vmem_limit_bytes():
    """Per-generation scoped VMEM limit (headroom for buffers at larger tiles)."""
    try:
        cap = getattr(pltpu.get_tpu_info(), "vmem_capacity_bytes", 64 * 1024 * 1024)
    except Exception:
        cap = 64 * 1024 * 1024
    return int(min(cap * 3 // 4, 96 * 1024 * 1024))


def up_forward(x1, x2, prep):
    """Up.forward(x1, x2): x1, x2 are NCHW; returns NCHW."""
    # 1) bilinear 2x upsample (align_corners=True), 2) F.pad, 3) channel concat.
    # TODO(synk): fold this gather/pad/concat/transpose glue into the kernel's
    # DMA pipeline (upsample-along-W as a small interpolation matmul; x2 and the
    # upsampled x1 as two lane-packed inputs) to drop 3-4 HBM round trips.
    x1u = upsample_bilinear_2x_align_corners(x1)
    diffY = x2.shape[2] - x1u.shape[2]
    diffX = x2.shape[3] - x1u.shape[3]
    x1p = jnp.pad(x1u, ((0, 0), (0, 0),
                        (diffY // 2, diffY - diffY // 2),
                        (diffX // 2, diffX - diffX // 2)))
    x = jnp.concatenate([x2, x1p], axis=1)                   # (N, Cin, H, W)
    N, Cin, H, W = x.shape
    Cmid = prep["g1"].shape[1]
    Cout = prep["g2"].shape[1]

    # Lane-pack rows as bf16 (MXU-native): NCHW -> (N, H, W*Cin) + 1-row halo.
    xrows = jnp.transpose(x, (0, 2, 3, 1)).reshape(N, H, W * Cin).astype(jnp.bfloat16)
    xp = jnp.pad(xrows, ((0, 0), (1, 1), (0, 0)))

    # Note: conv biases b1/b2 cancel exactly under training-mode BatchNorm.
    vmem = pl.BlockSpec(memory_space=pltpu.MemorySpace.VMEM)
    # TODO(synk): at production sizes, tile over N*H row blocks with a
    # dimension_semantics=("parallel",...) grid (2 TCs on v7x) and a two-phase
    # BN reduction; at these shapes the whole problem is a few KiB and a grid
    # would only add per-step overhead.
    out_packed = pl.pallas_call(
        _double_conv_kernel,
        out_shape=jax.ShapeDtypeStruct((N, H, W * Cout), jnp.float32),
        in_specs=[vmem] * 11,
        out_specs=vmem,
        scratch_shapes=[pltpu.VMEM((N, H + 2, W * Cmid), jnp.bfloat16)],
        compiler_params=pltpu.CompilerParams(vmem_limit_bytes=_vmem_limit_bytes()),
    )(xp, prep["w1f"], prep["w2f"], prep["r1"], prep["r1t"],
      prep["r2"], prep["r2t"], prep["g1"], prep["be1"], prep["g2"], prep["be2"])

    # (N, H, W*Cout) -> NCHW
    return jnp.transpose(out_packed.reshape(N, H, W, Cout), (0, 3, 1, 2))


# --------------------------- pure-JAX reference ------------------------------
def ref_up_forward(x1, x2, params):
    x1u = upsample_bilinear_2x_align_corners(x1)
    diffY = x2.shape[2] - x1u.shape[2]
    diffX = x2.shape[3] - x1u.shape[3]
    x1p = jnp.pad(x1u, ((0, 0), (0, 0),
                        (diffY // 2, diffY - diffY // 2),
                        (diffX // 2, diffX - diffX // 2)))
    x = jnp.concatenate([x2, x1p], axis=1)

    def conv_bn_relu(h, w, b, g, be):
        y = jax.lax.conv_general_dilated(
            h, w, (1, 1), 'SAME',
            dimension_numbers=('NCHW', 'OIHW', 'NCHW'),
            precision=jax.lax.Precision.HIGHEST)
        y = y + b[None, :, None, None]
        mu = jnp.mean(y, axis=(0, 2, 3), keepdims=True)
        var = jnp.mean((y - mu) ** 2, axis=(0, 2, 3), keepdims=True)
        y = g[None, :, None, None] * (y - mu) / jnp.sqrt(var + EPS) + be[None, :, None, None]
        return jnp.maximum(y, 0.0)

    y = conv_bn_relu(x, params["w1"], params["b1"], params["g1"], params["be1"])
    y = conv_bn_relu(y, params["w2"], params["b2"], params["g2"], params["be2"])
    return y


# ---------------------------------- main -------------------------------------
if __name__ == "__main__":
    key = jax.random.PRNGKey(0)
    k1, k2, kp = jax.random.split(key, 3)

    # Up(in_channels=8, out_channels=8, bilinear=True):
    #   x1 (deep features, pre-upsample): (2, 4, 8, 8)
    #   x2 (skip connection):             (2, 4, 16, 16)
    #   cat channels = 4 + 4 = 8 = in_channels; mid = 4.
    in_channels, out_channels = 8, 8
    x1 = jax.random.normal(k1, (2, 4, 8, 8), jnp.float32)
    x2 = jax.random.normal(k2, (2, 4, 16, 16), jnp.float32)
    params = init_params(kp, in_channels, out_channels)

    # One-time weight prep (hoisted out of the jitted forward).
    prep = precompute_up_params(params, width=x2.shape[3])

    out = jax.block_until_ready(jax.jit(up_forward)(x1, x2, prep))
    ref = jax.block_until_ready(jax.jit(ref_up_forward)(x1, x2, params))

    assert out.shape == (2, out_channels, 16, 16), out.shape
    max_err = float(jnp.max(jnp.abs(out - ref)))
    # bf16 MXU operands (f32 accumulation) vs an f32 HIGHEST-precision reference;
    # outputs are BatchNorm-standardized (~unit scale).
    assert max_err < 6e-2, f"max abs error {max_err}"
    print("KERNEL_OK")
</pallas_src>

<mosaic_0001>
module attributes {stable_mosaic.version = 11 : i64} {
  func.func @_double_conv_kernel(%arg0: memref<2x18x128xbf16, #tpu.memory_space<vmem>>, %arg1: memref<384x64xbf16, #tpu.memory_space<vmem>>, %arg2: memref<192x128xbf16, #tpu.memory_space<vmem>>, %arg3: memref<64x4xf32, #tpu.memory_space<vmem>>, %arg4: memref<4x64xf32, #tpu.memory_space<vmem>>, %arg5: memref<128x8xf32, #tpu.memory_space<vmem>>, %arg6: memref<8x128xf32, #tpu.memory_space<vmem>>, %arg7: memref<1x4xf32, #tpu.memory_space<vmem>>, %arg8: memref<1x4xf32, #tpu.memory_space<vmem>>, %arg9: memref<1x8xf32, #tpu.memory_space<vmem>>, %arg10: memref<1x8xf32, #tpu.memory_space<vmem>>, %arg11: memref<2x16x128xf32, #tpu.memory_space<vmem>>, %arg12: memref<2x18x64xbf16, #tpu.memory_space<vmem>>) attributes {dimension_semantics = [], scalar_prefetch = 0 : i64, scratch_operands = 1 : i64, tpu.core_type = #tpu.core_type<tc>} {
    %c0 = arith.constant 0 : index
    %c0_0 = arith.constant 0 : index
    %c0_1 = arith.constant 0 : index
    %0 = vector.load %arg0[%c0, %c0_0, %c0_1] : memref<2x18x128xbf16, #tpu.memory_space<vmem>>, vector<2x16x128xbf16>
    %c0_2 = arith.constant 0 : index
    %c1 = arith.constant 1 : index
    %c0_3 = arith.constant 0 : index
    %1 = vector.load %arg0[%c0_2, %c1, %c0_3] : memref<2x18x128xbf16, #tpu.memory_space<vmem>>, vector<2x16x128xbf16>
    %c0_4 = arith.constant 0 : index
    %c2 = arith.constant 2 : index
    %c0_5 = arith.constant 0 : index
    %2 = vector.load %arg0[%c0_4, %c2, %c0_5] : memref<2x18x128xbf16, #tpu.memory_space<vmem>>, vector<2x16x128xbf16>
    %3 = tpu.concatenate %0, %1, %2 in 2 : vector<2x16x128xbf16>, vector<2x16x128xbf16>, vector<2x16x128xbf16> -> vector<2x16x384xbf16>
    %4 = vector.shape_cast %3 : vector<2x16x384xbf16> to vector<32x384xbf16>
    %c0_6 = arith.constant 0 : index
    %c0_7 = arith.constant 0 : index
    %5 = vector.load %arg1[%c0_6, %c0_7] : memref<384x64xbf16, #tpu.memory_space<vmem>>, vector<384x64xbf16>
    %cst = arith.constant dense<0.000000e+00> : vector<32x64xf32>
    %6 = tpu.matmul %4, %5, %cst {dimension_numbers = #tpu.dot_dimension_numbers<[1], [0], [0], [1], [0, 0, 1, 1], [], []>} : vector<32x384xbf16>, vector<384x64xbf16>, vector<32x64xf32> -> vector<32x64xf32>
    %c0_8 = arith.constant 0 : index
    %c0_9 = arith.constant 0 : index
    %7 = vector.load %arg3[%c0_8, %c0_9] : memref<64x4xf32, #tpu.memory_space<vmem>>, vector<64x4xf32>
    %c0_10 = arith.constant 0 : index
    %c0_11 = arith.constant 0 : index
    %8 = vector.load %arg4[%c0_10, %c0_11] : memref<4x64xf32, #tpu.memory_space<vmem>>, vector<4x64xf32>
    %c0_12 = arith.constant 0 : index
    %c0_13 = arith.constant 0 : index
    %9 = vector.load %arg7[%c0_12, %c0_13] : memref<1x4xf32, #tpu.memory_space<vmem>>, vector<1x4xf32>
    %c0_14 = arith.constant 0 : index
    %c0_15 = arith.constant 0 : index
    %10 = vector.load %arg8[%c0_14, %c0_15] : memref<1x4xf32, #tpu.memory_space<vmem>>, vector<1x4xf32>
    %cst_16 = arith.constant dense<0.000000e+00> : vector<64xf32>
    %11 = vector.multi_reduction <add>, %6, %cst_16 [0] : vector<32x64xf32> to vector<64xf32>
    %12 = vector.shape_cast %11 : vector<64xf32> to vector<1x64xf32>
    %13 = arith.mulf %6, %6 : vector<32x64xf32>
    %cst_17 = arith.constant dense<0.000000e+00> : vector<64xf32>
    %14 = vector.multi_reduction <add>, %13, %cst_17 [0] : vector<32x64xf32> to vector<64xf32>
    %15 = vector.shape_cast %14 : vector<64xf32> to vector<1x64xf32>
    %16 = tpu.concatenate %12, %15 in 0 : vector<1x64xf32>, vector<1x64xf32> -> vector<2x64xf32>
    %cst_18 = arith.constant dense<0.000000e+00> : vector<2x4xf32>
    %17 = tpu.matmul %16, %7, %cst_18 {dimension_numbers = #tpu.dot_dimension_numbers<[1], [0], [0], [1], [0, 0, 1, 1], [], []>} : vector<2x64xf32>, vector<64x4xf32>, vector<2x4xf32> -> vector<2x4xf32>
    %18 = vector.extract_strided_slice %17 {offsets = [0, 0], sizes = [1, 4], strides = [1, 1]} : vector<2x4xf32> to vector<1x4xf32>
    %cst_19 = arith.constant 0.001953125 : f32
    %19 = vector.broadcast %cst_19 : f32 to vector<1x4xf32>
    %20 = arith.mulf %18, %19 : vector<1x4xf32>
    %21 = vector.extract_strided_slice %17 {offsets = [1, 0], sizes = [1, 4], strides = [1, 1]} : vector<2x4xf32> to vector<1x4xf32>
    %cst_20 = arith.constant 0.001953125 : f32
    %22 = vector.broadcast %cst_20 : f32 to vector<1x4xf32>
    %23 = arith.mulf %21, %22 : vector<1x4xf32>
    %24 = arith.mulf %20, %20 : vector<1x4xf32>
    %25 = arith.subf %23, %24 : vector<1x4xf32>
    %cst_21 = arith.constant 0.000000e+00 : f32
    %26 = vector.broadcast %cst_21 : f32 to vector<1x4xf32>
    %27 = arith.maximumf %25, %26 : vector<1x4xf32>
    %cst_22 = arith.constant 9.99999974E-6 : f32
    %28 = vector.broadcast %cst_22 : f32 to vector<1x4xf32>
    %29 = arith.addf %27, %28 : vector<1x4xf32>
    %30 = math.rsqrt %29 : vector<1x4xf32>
    %31 = arith.mulf %9, %30 : vector<1x4xf32>
    %32 = arith.mulf %20, %31 : vector<1x4xf32>
    %33 = arith.subf %10, %32 : vector<1x4xf32>
    %34 = tpu.concatenate %31, %33 in 0 : vector<1x4xf32>, vector<1x4xf32> -> vector<2x4xf32>
    %cst_23 = arith.constant dense<0.000000e+00> : vector<2x64xf32>
    %35 = tpu.matmul %34, %8, %cst_23 {dimension_numbers = #tpu.dot_dimension_numbers<[1], [0], [0], [1], [0, 0, 1, 1], [], []>} : vector<2x4xf32>, vector<4x64xf32>, vector<2x64xf32> -> vector<2x64xf32>
    %36 = vector.extract_strided_slice %35 {offsets = [0, 0], sizes = [1, 64], strides = [1, 1]} : vector<2x64xf32> to vector<1x64xf32>
    %37 = vector.broadcast %36 : vector<1x64xf32> to vector<32x64xf32>
    %38 = arith.mulf %6, %37 : vector<32x64xf32>
    %39 = vector.extract_strided_slice %35 {offsets = [1, 0], sizes = [1, 64], strides = [1, 1]} : vector<2x64xf32> to vector<1x64xf32>
    %40 = vector.broadcast %39 : vector<1x64xf32> to vector<32x64xf32>
    %41 = arith.addf %38, %40 : vector<32x64xf32>
    %cst_24 = arith.constant 0.000000e+00 : f32
    %42 = vector.broadcast %cst_24 : f32 to vector<32x64xf32>
    %43 = arith.maximumf %41, %42 : vector<32x64xf32>
    %cst_25 = arith.constant 0.000000e+00 : bf16
    %44 = vector.broadcast %cst_25 : bf16 to vector<2x1x64xbf16>
    %c0_26 = arith.constant 0 : index
    %c0_27 = arith.constant 0 : index
    %c0_28 = arith.constant 0 : index
    %45 = vector.load %arg12[%c0_26, %c0_27, %c0_28] : memref<2x18x64xbf16, #tpu.memory_space<vmem>>, vector<2x1x64xbf16>
    tpu.vector_store %arg12[%c0_26, %c0_27, %c0_28], %44 {strides = array<i32>} : memref<2x18x64xbf16, #tpu.memory_space<vmem>>, vector<2x1x64xbf16>,
    %c0_29 = arith.constant 0 : index
    %c17 = arith.constant 17 : index
    %c0_30 = arith.constant 0 : index
    %46 = vector.load %arg12[%c0_29, %c17, %c0_30] : memref<2x18x64xbf16, #tpu.memory_space<vmem>>, vector<2x1x64xbf16>
    tpu.vector_store %arg12[%c0_29, %c17, %c0_30], %44 {strides = array<i32>} : memref<2x18x64xbf16, #tpu.memory_space<vmem>>, vector<2x1x64xbf16>,
    %47 = vector.shape_cast %43 : vector<32x64xf32> to vector<2x16x64xf32>
    %48 = arith.truncf %47 : vector<2x16x64xf32> to vector<2x16x64xbf16>
    %c0_31 = arith.constant 0 : index
    %c1_32 = arith.constant 1 : index
    %c0_33 = arith.constant 0 : index
    %49 = vector.load %arg12[%c0_31, %c1_32, %c0_33] : memref<2x18x64xbf16, #tpu.memory_space<vmem>>, vector<2x16x64xbf16>
    tpu.vector_store %arg12[%c0_31, %c1_32, %c0_33], %48 {strides = array<i32>} : memref<2x18x64xbf16, #tpu.memory_space<vmem>>, vector<2x16x64xbf16>,
    %c0_34 = arith.constant 0 : index
    %c0_35 = arith.constant 0 : index
    %c0_36 = arith.constant 0 : index
    %50 = vector.load %arg12[%c0_34, %c0_35, %c0_36] : memref<2x18x64xbf16, #tpu.memory_space<vmem>>, vector<2x16x64xbf16>
    %c0_37 = arith.constant 0 : index
    %c1_38 = arith.constant 1 : index
    %c0_39 = arith.constant 0 : index
    %51 = vector.load %arg12[%c0_37, %c1_38, %c0_39] : memref<2x18x64xbf16, #tpu.memory_space<vmem>>, vector<2x16x64xbf16>
    %c0_40 = arith.constant 0 : index
    %c2_41 = arith.constant 2 : index
    %c0_42 = arith.constant 0 : index
    %52 = vector.load %arg12[%c0_40, %c2_41, %c0_42] : memref<2x18x64xbf16, #tpu.memory_space<vmem>>, vector<2x16x64xbf16>
    %53 = tpu.concatenate %50, %51, %52 in 2 : vector<2x16x64xbf16>, vector<2x16x64xbf16>, vector<2x16x64xbf16> -> vector<2x16x192xbf16>
    %54 = vector.shape_cast %53 : vector<2x16x192xbf16> to vector<32x192xbf16>
    %c0_43 = arith.constant 0 : index
    %c0_44 = arith.constant 0 : index
    %55 = vector.load %arg2[%c0_43, %c0_44] : memref<192x128xbf16, #tpu.memory_space<vmem>>, vector<192x128xbf16>
    %cst_45 = arith.constant dense<0.000000e+00> : vector<32x128xf32>
    %56 = tpu.matmul %54, %55, %cst_45 {dimension_numbers = #tpu.dot_dimension_numbers<[1], [0], [0], [1], [0, 0, 1, 1], [], []>} : vector<32x192xbf16>, vector<192x128xbf16>, vector<32x128xf32> -> vector<32x128xf32>
    %c0_46 = arith.constant 0 : index
    %c0_47 = arith.constant 0 : index
    %57 = vector.load %arg5[%c0_46, %c0_47] : memref<128x8xf32, #tpu.memory_space<vmem>>, vector<128x8xf32>
    %c0_48 = arith.constant 0 : index
    %c0_49 = arith.constant 0 : index
    %58 = vector.load %arg6[%c0_48, %c0_49] : memref<8x128xf32, #tpu.memory_space<vmem>>, vector<8x128xf32>
    %c0_50 = arith.constant 0 : index
    %c0_51 = arith.constant 0 : index
    %59 = vector.load %arg9[%c0_50, %c0_51] : memref<1x8xf32, #tpu.memory_space<vmem>>, vector<1x8xf32>
    %c0_52 = arith.constant 0 : index
    %c0_53 = arith.constant 0 : index
    %60 = vector.load %arg10[%c0_52, %c0_53] : memref<1x8xf32, #tpu.memory_space<vmem>>, vector<1x8xf32>
    %cst_54 = arith.constant dense<0.000000e+00> : vector<128xf32>
    %61 = vector.multi_reduction <add>, %56, %cst_54 [0] : vector<32x128xf32> to vector<128xf32>
    %62 = vector.shape_cast %61 : vector<128xf32> to vector<1x128xf32>
    %63 = arith.mulf %56, %56 : vector<32x128xf32>
    %cst_55 = arith.constant dense<0.000000e+00> : vector<128xf32>
    %64 = vector.multi_reduction <add>, %63, %cst_55 [0] : vector<32x128xf32> to vector<128xf32>
    %65 = vector.shape_cast %64 : vector<128xf32> to vector<1x128xf32>
    %66 = tpu.concatenate %62, %65 in 0 : vector<1x128xf32>, vector<1x128xf32> -> vector<2x128xf32>
    %cst_56 = arith.constant dense<0.000000e+00> : vector<2x8xf32>
    %67 = tpu.matmul %66, %57, %cst_56 {dimension_numbers = #tpu.dot_dimension_numbers<[1], [0], [0], [1], [0, 0, 1, 1], [], []>} : vector<2x128xf32>, vector<128x8xf32>, vector<2x8xf32> -> vector<2x8xf32>
    %68 = vector.extract_strided_slice %67 {offsets = [0, 0], sizes = [1, 8], strides = [1, 1]} : vector<2x8xf32> to vector<1x8xf32>
    %cst_57 = arith.constant 0.001953125 : f32
    %69 = vector.broadcast %cst_57 : f32 to vector<1x8xf32>
    %70 = arith.mulf %68, %69 : vector<1x8xf32>
    %71 = vector.extract_strided_slice %67 {offsets = [1, 0], sizes = [1, 8], strides = [1, 1]} : vector<2x8xf32> to vector<1x8xf32>
    %cst_58 = arith.constant 0.001953125 : f32
    %72 = vector.broadcast %cst_58 : f32 to vector<1x8xf32>
    %73 = arith.mulf %71, %72 : vector<1x8xf32>
    %74 = arith.mulf %70, %70 : vector<1x8xf32>
    %75 = arith.subf %73, %74 : vector<1x8xf32>
    %cst_59 = arith.constant 0.000000e+00 : f32
    %76 = vector.broadcast %cst_59 : f32 to vector<1x8xf32>
    %77 = arith.maximumf %75, %76 : vector<1x8xf32>
    %cst_60 = arith.constant 9.99999974E-6 : f32
    %78 = vector.broadcast %cst_60 : f32 to vector<1x8xf32>
    %79 = arith.addf %77, %78 : vector<1x8xf32>
    %80 = math.rsqrt %79 : vector<1x8xf32>
    %81 = arith.mulf %59, %80 : vector<1x8xf32>
    %82 = arith.mulf %70, %81 : vector<1x8xf32>
    %83 = arith.subf %60, %82 : vector<1x8xf32>
    %84 = tpu.concatenate %81, %83 in 0 : vector<1x8xf32>, vector<1x8xf32> -> vector<2x8xf32>
    %cst_61 = arith.constant dense<0.000000e+00> : vector<2x128xf32>
    %85 = tpu.matmul %84, %58, %cst_61 {dimension_numbers = #tpu.dot_dimension_numbers<[1], [0], [0], [1], [0, 0, 1, 1], [], []>} : vector<2x8xf32>, vector<8x128xf32>, vector<2x128xf32> -> vector<2x128xf32>
    %86 = vector.extract_strided_slice %85 {offsets = [0, 0], sizes = [1, 128], strides = [1, 1]} : vector<2x128xf32> to vector<1x128xf32>
    %87 = vector.broadcast %86 : vector<1x128xf32> to vector<32x128xf32>
    %88 = arith.mulf %56, %87 : vector<32x128xf32>
    %89 = vector.extract_strided_slice %85 {offsets = [1, 0], sizes = [1, 128], strides = [1, 1]} : vector<2x128xf32> to vector<1x128xf32>
    %90 = vector.broadcast %89 : vector<1x128xf32> to vector<32x128xf32>
    %91 = arith.addf %88, %90 : vector<32x128xf32>
    %cst_62 = arith.constant 0.000000e+00 : f32
    %92 = vector.broadcast %cst_62 : f32 to vector<32x128xf32>
    %93 = arith.maximumf %91, %92 : vector<32x128xf32>
    %94 = vector.shape_cast %93 : vector<32x128xf32> to vector<2x16x128xf32>
    %c0_63 = arith.constant 0 : index
    %c0_64 = arith.constant 0 : index
    %c0_65 = arith.constant 0 : index
    %95 = vector.load %arg11[%c0_63, %c0_64, %c0_65] : memref<2x16x128xf32, #tpu.memory_space<vmem>>, vector<2x16x128xf32>
    tpu.vector_store %arg11[%c0_63, %c0_64, %c0_65], %94 {strides = array<i32>} : memref<2x16x128xf32, #tpu.memory_space<vmem>>, vector<2x16x128xf32>,
    return
  }
}

</mosaic_0001>

<bundles_post_ra>
// kernel: up_forward.1
= control target key start
LH: loop header
LB: loop body
LE: loop exit
PB: predicated region body
PF: predicated region fallthrough
CT: control target
= control target key end

     0   :  { %vm98_vm0 = vcmask 1046528   ;;  %vm65_vm1 = vsmask.f32 7424  ;;  %v1515_v59 = vmov 0.0|0.0   ;;  %vm1516_vm2 = vmmov 0   ;;  %s1520_s22 = smov 64   ;;  %s1954_s1 = inlined_call_operand.vmem [shape: bf16[384,64], index: 1, kind: input, shape index: {}]   ;;  %s1955_s0 = inlined_call_operand.vmem [shape: bf16[2,18,128], index: 0, kind: input, shape index: {}]   ;;  %s1956_s3 = inlined_call_operand.vmem [shape: f32[64,4], index: 3, kind: input, shape index: {}]   ;;  %s1957_s4 = inlined_call_operand.vmem [shape: f32[4,64], index: 4, kind: input, shape index: {}]   ;;  %s1958_s7 = inlined_call_operand.vmem [shape: f32[1,4], index: 7, kind: input, shape index: {}]   ;;  %s1959_s8 = inlined_call_operand.vmem [shape: f32[1,4], index: 8, kind: input, shape index: {}]   ;;  %s1960_s2 = inlined_call_operand.vmem [shape: bf16[192,128], index: 2, kind: input, shape index: {}]   ;;  %s1961_s5 = inlined_call_operand.vmem [shape: f32[128,8], index: 5, kind: input, shape index: {}]   ;;  %s1962_s6 = inlined_call_operand.vmem [shape: f32[8,128], index: 6, kind: input, shape index: {}]   ;;  %s1963_s9 = inlined_call_operand.vmem [shape: f32[1,8], index: 9, kind: input, shape index: {}]   ;;  %s1964_s10 = inlined_call_operand.vmem [shape: f32[1,8], index: 10, kind: input, shape index: {}]   ;;  %s1965_s11 = inlined_call_operand.vmem [shape: f32[2,16,128], index: 11, kind: output, shape index: {}]  }
   0x1   :  { %v1463_v0 = vld [vmem:[%s1954_s1 + $0x40] sm:$0xff]   ;;  %v1466_v3 = vld [vmem:[%s1954_s1 + $0x48] sm:$0xff]   ;;  %v1469_v6 = vld [vmem:[%s1954_s1 + $0x50] sm:$0xff]   ;;  %vm408_vm3 = vcmask 523264   ;;  %vm439_vm4 = vcmask 1040384   ;;  %vm554_vm5 = vcmask 1043456  }
   0x2   :  { %v1464_v1 = vld [vmem:[%s1954_s1] sm:$0xff]   ;;  %1269 = vmatprep.subr.bf16.mxu0 %v1463_v0  ;;  %v1467_v4 = vld [vmem:[%s1954_s1 + $0x8] sm:$0xff]   ;;  %v1470_v7 = vld [vmem:[%s1954_s1 + $0x10] sm:$0xff]   ;;  %vm550_vm6 = vcmask 31744   ;;  %vm648_vm7 = vcmask 516096   ;;  %vm719_vm13 = vcmask 519168  }
   0x3   :  { %v1465_v2 = vld [vmem:[%s1954_s1 + $0x80] sm:$0xff]   ;;  %1270 = vmatpush3.bf16.msra.mxu0 %v1464_v1  ;;  %v1468_v5 = vld [vmem:[%s1954_s1 + $0x88] sm:$0xff]   ;;  %v1471_v8 = vld [vmem:[%s1954_s1 + $0x90] sm:$0xff]   ;;  %vm649_vm8 = vsmask.f32 256 }
   0x4   :  { %1337 = vmatprep.subr.bf16.mxu1 %v1465_v2  ;;  %1271 = vmatprep.subr.bf16.mxu0 %v1466_v3  ;;  %v1472_v9 = vld [vmem:[%s1954_s1 + $0x58] sm:$0xff]   ;;  %v1475_v12 = vld [vmem:[%s1954_s1 + $0x60] sm:$0xff]   ;;  %v1478_v15 = vld [vmem:[%s1954_s1 + $0x68] sm:$0xff]   ;;  %vm657_vm9 = vsmask.f32 7938 }
   0x5   :  { %1338 = vmatpush3.bf16.msra.mxu1 %v1465_v2  ;;  %v1473_v10 = vld [vmem:[%s1954_s1 + $0x18] sm:$0xff]   ;;  %v1477_v13 = vld [vmem:[%s1954_s1 + $0xa0] sm:$0xff]   ;;  %v1480_v16 = vld [vmem:[%s1954_s1 + $0xa8] sm:$0xff]   ;;  %vm677_vm12 = vsmask.f32 4368 }
   0x6   :  { %1339 = vmatprep.subr.bf16.mxu1 %v1468_v5  ;;  %v1474_v11 = vld [vmem:[%s1954_s1 + $0x98] sm:$0xff]   ;;  %v1476_v14 = vld [vmem:[%s1954_s1 + $0x20] sm:$0xff]   ;;  %v1479_v17 = vld [vmem:[%s1954_s1 + $0x28] sm:$0xff]  }
   0x7   :  { %1272 = vmatpush3.bf16.msra.mxu0 %v1467_v4  ;;  %v1481_v18 = vld [vmem:[%s1954_s1 + $0x70] sm:$0xff]   ;;  %v1484_v21 = vld [vmem:[%s1954_s1 + $0x78] sm:$0xff]   ;;  %v39_v22 = vld [vmem:[%s1955_s0] sm:$0xf] }
   0x8   :  { %1273 = vmatprep.subr.bf16.mxu0 %v1469_v6  ;;  %v1482_v19 = vld [vmem:[%s1954_s1 + $0x30] sm:$0xff]   ;;  %v40_v23 = vld [vmem:[%s1955_s0 + $0x4] sm:$0xf]  ;;  %v1485_v24 = vld [vmem:[%s1954_s1 + $0x38] sm:$0xff]  }
   0x9   :  { %1340 = vmatpush3.bf16.msra.mxu1 %v1468_v5  ;;  %v1483_v20 = vld [vmem:[%s1954_s1 + $0xb0] sm:$0xff]   ;;  %v1486_v25 = vld [vmem:[%s1954_s1 + $0xb8] sm:$0xff]   ;;  %v1207_v26 = vcombine.low %v39_v22, %v40_v23  ;;  %v1488_v27 = vld [vmem:[%s1955_s0 + $0x8] ss:$0 sps:$4 sm:$0x11]   ;;  %v1517_v5 = vmov 0.0  }
   0xa   :  { %1341 = vmatprep.subr.bf16.mxu1 %v1471_v8  ;;  %v45_v28 = vld [vmem:[%s1955_s0] sm:$0xe]  ;;  %v41_v30 = vld [vmem:[%s1955_s0 + $0xc] sm:$0xf]  ;;  %v42_v31 = vld [vmem:[%s1955_s0 + $0x10] sm:$0xf] }
   0xb   :  { %1274 = vmatpush3.bf16.msra.mxu0 %v1470_v7  ;;  %v1211_v29 = vcombine.low %v45_v28, %v40_v23  ;;  %v67_v32 = vshrl.u32 %v1207_v26, 16  ;;  %v69_v33 = vshll.u32 %v1207_v26, 16  ;;  %v74_v34 = vshll.u32 %v1488_v27, 16  ;;  %v46_v36 = vld [vmem:[%s1955_s0 + $0xc] sm:$0xe]  ;;  %v397_v56 = vld [vmem:[%s1956_s3] sm:$0xff]  ;;  %vm1769_vm10 = vmand %vm648_vm7, %vm649_vm8 }
   0xc   :  { %1275 = vmatprep.subr.bf16.mxu0 %v1472_v9  ;;  %v100_v35 = vrot.slane %v1488_v27, 1  ;;  %v1208_v38 = vcombine.low %v41_v30, %v42_v31  ;;  %v1491_v39 = vld [vmem:[%s1955_s0 + $0x14] ss:$0 sps:$4 sm:$0x11]   ;;  %v1212_v40 = vcombine.low %v46_v36, %v42_v31  ;;  %v398_v57 = vld [vmem:[%s1956_s3 + $0x8] sm:$0xff]  ;;  %v400_v61 = vld [vmem:[%s1956_s3 + $0x18] sm:$0xff] }
   0xd   :  { %1342 = vmatpush3.bf16.msra.mxu1 %v1471_v8  ;;  %v99_v37 = vrot.slane %v1211_v29, 1  ;;  %v71_v41 = vrot.slane %v69_v33, 1  ;;  %v76_v42 = vrot.slane %v74_v34, 1  ;;  %v103_v45 = vrot.slane %v1491_v39, 1  ;;  %v399_v60 = vld [vmem:[%s1956_s3 + $0x10] sm:$0xff]  ;;  %v401_v63 = vld [vmem:[%s1956_s3 + $0x20] sm:$0xff]  ;;  %vm658_vm11 = vmand %vm648_vm7, %vm657_vm9 }
   0xe   :  { %1343 = vmatprep.subr.bf16.mxu1 %v1474_v11  ;;  %v102_v44 = vrot.slane %v1212_v40, 1  ;;  %v79_v47 = vshrl.u32 %v1208_v38, 16  ;;  %v81_v48 = vshll.u32 %v1208_v38, 16  ;;  %v86_v49 = vshll.u32 %v1491_v39, 16  ;;  %v402_v0 = vld [vmem:[%s1956_s3 + $0x28] sm:$0xff]  ;;  %v403_v2 = vld [vmem:[%s1956_s3 + $0x30] sm:$0xff]  ;;  %vm1823_vm14 = vmor %vm649_vm8, %vm677_vm12 }
   0xf   :  { %1276 = vmatpush3.bf16.msra.mxu0 %v1473_v10  ;;  %v101_v43 = vsel %vm98_vm0, %v99_v37, %v100_v35  ;;  %v72_v46 = vor.u32 %v71_v41, %v67_v32  ;;  %v1422_v58 = vpack.c.bf16 %v398_v57, %v397_v56  ;;  %v1425_v62 = vpack.c.bf16 %v400_v61, %v399_v60  ;;  %v404_v3 = vld [vmem:[%s1956_s3 + $0x38] sm:$0xff]  ;;  %v405_v57 = vld [vmem:[%s1957_s4] sm:$0xf]  ;;  %vm1829_vm15 = vmand %vm719_vm13, %vm657_vm9 }
  0x10   :  { %1277 = vmatprep.subr.bf16.mxu0 %v1475_v12  ;;  %1353 = vmatprep.mubr.bf16.mxu1 %v101_v43  ;;  %v104_v51 = vsel %vm98_vm0, %v102_v44, %v103_v45  ;;  %v83_v52 = vrot.slane %v81_v48, 1  ;;  %v88_v53 = vrot.slane %v86_v49, 1  ;;  %v1428_v1 = vpack.c.bf16 %v402_v0, %v401_v63 }
  0x11   :  { %1344 = vmatpush3.bf16.msra.mxu1 %v1474_v11  ;;  %v77_v50 = vsel %vm65_vm1, %v72_v46, %v76_v42  ;;  %v1431_v4 = vpack.c.bf16 %v404_v3, %v403_v2  ;;  %v1518_v3 = vmov 1966171168  }
  0x12   :  { %1345 = vmatprep.subr.bf16.mxu1 %v1477_v13  ;;  %331 = vmatprep.mubr.bf16.mxu0 %v77_v50  ;;  %v84_v54 = vor.u32 %v83_v52, %v79_v47 }
  0x13   :  { %1278 = vmatpush3.bf16.msra.mxu0 %v1476_v14 }
  0x14   :  { %1279 = vmatprep.subr.bf16.mxu0 %v1478_v15  ;;  %v89_v55 = vsel %vm65_vm1, %v84_v54, %v88_v53 }
  0x15   :  { %1346 = vmatpush3.bf16.msra.mxu1 %v1477_v13 }
  0x16   :  { %1347 = vmatprep.subr.bf16.mxu1 %v1480_v16 }
  0x17   :  { %1280 = vmatpush3.bf16.msra.mxu0 %v1479_v17 }
  0x18   :  { %1281 = vmatprep.subr.bf16.mxu0 %v1481_v18 }
  0x19   :  { %1348 = vmatpush3.bf16.msra.mxu1 %v1480_v16 }
  0x1a   :  { %1349 = vmatprep.subr.bf16.mxu1 %v1483_v20 }
  0x1b   :  { %1282 = vmatpush3.bf16.msra.mxu0 %v1482_v19 }
  0x1c   :  { %1283 = vmatprep.subr.bf16.mxu0 %v1484_v21 }
  0x1d   :  { %1350 = vmatpush3.bf16.msra.mxu1 %v1483_v20 }
  0x1e   :  { %1351 = vmatprep.subr.bf16.mxu1 %v1486_v25 }
  0x1f   :  { %1284 = vmatpush3.bf16.msra.mxu0 %v1485_v24 }
  0x20   :  { %1421 = vmatprep.subr.bf16.mxu0 %v1515_v59 }
  0x21   :  { %1352 = vmatpush3.bf16.msra.mxu1 %v1486_v25 }
  0x22   :  { %332 = vmatmul.mubr.bf16.vlgmr.msra.gmra.mrb[0].mxu0 %v1207_v26 }
  0x23   :  { %339 = vmatprep.mubr.bf16.mxu0 %v89_v55  ;;  %1423 = vmatpush3.bf16.msra.mxu0 %v1422_v58 }
  0x24   :  { %1354 = vmatmul.mubr.bf16.vlgmr.msra.gmra.mrb[0].mxu1 %v104_v51  ;;  %1424 = vmatprep.subr.bf16.mxu0 %v1515_v59 }
  0x27   :  { %1426 = vmatpush3.bf16.msra.mxu0 %v1425_v62 }
  0x28   :  { %1427 = vmatprep.subr.bf16.mxu0 %v1515_v59 }
  0x2a   :  { %340 = vmatmul.mubr.bf16.gmra.mrb[4].mxu0 %v1208_v38 }
  0x2b   :  { %1429 = vmatpush3.bf16.msra.mxu0 %v1428_v1  ;;  %1373 = vmatprep.mubr.msk.f32.mxu0 %vm1516_vm2, %v1517_v5 }
  0x2c   :  { %1430 = vmatprep.subr.bf16.mxu0 %v1515_v59 }
  0x2f   :  { %1432 = vmatpush3.bf16.msra.mxu0 %v1431_v4  ;;  %v525_v4 = vunpack.c.l.s4 %v1518_v3 }
  0x30   :  { %1376 = vmatprep.subr.mxu0 %v1517_v5 }
  0xf5   :  { %v1285_v6 = vpop.f32.mrb[0].mxu0 }
  0xf6   :  { %v1286_v7 = vpop.f32.mrb[1].mxu0 }
  0xf7   :  { %v1355_v8 = vpop.f32.mrb[0].mxu1  ;;  %v1287_v9 = vadd.f32 %v1286_v7, %v1285_v6  ;;  %v1288_v10 = vpop.f32.mrb[2].mxu0  ;;  %v527_v6 = vlaneseq  ;;  %v526_v7 = vunpack.c.0.s8 %v525_v4 }
  0xf8   :  { %v382_v11 = vpop.f32.mrb[1].mxu1  ;;  %v1289_v12 = vpop.f32.mrb[3].mxu0 }
  0xf9   :  { %v1356_v13 = vpop.f32.mrb[2].mxu1  ;;  %v1290_v14 = vadd.f32 %v1289_v12, %v1288_v10  ;;  %v1712_v15 = vadd.f32 %v1287_v9, %v382_v11 }
  0xfa   :  { %v385_v16 = vpop.f32.mrb[3].mxu1 }
  0xfb   :  { %v1714_v17 = vadd.f32 %v1290_v14, %v385_v16  ;;  %v422_v21 = vmul.f32 %v1712_v15, %v1712_v15  ;;  %v409_v26 = vsel %vm408_vm3, %v1712_v15, 0.0 }
  0xfd   :  { %v423_v18 = vmul.f32 %v1714_v17, %v1714_v17  ;;  %v1291_v19 = vpop.f32.mrb[4].mxu0  ;;  %v410_v22 = vsel %vm408_vm3, %v1714_v17, 0.0  ;;  %v426_v31 = vsel %vm408_vm3, %v422_v21, 0.0 }
  0xfe   :  { %v1292_v20 = vpop.f32.mrb[5].mxu0  ;;  %v411_v30 = vadd.f32 %v410_v22, %v409_v26  ;;  %v654_v26 = vld [vmem:[#allocation2 + $0xc] sm:$0x1] }
  0xff   :  { %v1293_v23 = vadd.f32 %v1292_v20, %v1291_v19  ;;  %v1294_v24 = vpop.f32.mrb[6].mxu0  ;;  %v427_v27 = vsel %vm408_vm3, %v423_v18, 0.0  ;;  %v407_v18 = vld [vmem:[%s1959_s8] sm:$0x1] }
 0x100   :  { %v1295_v25 = vpop.f32.mrb[7].mxu0  ;;  %v428_v35 = vadd.f32 %v427_v27, %v426_v31  ;;  %v662_v31 = vld [vmem:[#allocation2 + $0x14] sm:$0x1] }
 0x101   :  { %v1725_v28 = vadd.f32 %v1355_v8, %v1293_v23  ;;  %v1296_v29 = vadd.f32 %v1295_v25, %v1294_v24  ;;  %v1748_v8 = vshrl.u32 %v527_v6, 7  ;;  %v651_v25 = vld [vmem:[#allocation2] sm:$0x1] }
 0x102   :  { %v652_v27 = vsel %vm1769_vm10, 0, %v651_v25 }
 0x103   :  { %v412_v32 = vsel %vm408_vm3, %v1725_v28, 0.0  ;;  %v424_v33 = vmul.f32 %v1725_v28, %v1725_v28  ;;  %v1732_v34 = vadd.f32 %v1356_v13, %v1296_v29  ;;  %v1751_v9 = vsub.s32 %v526_v7, %v1748_v8  ;;  %v406_v13 = vld [vmem:[%s1958_s7] sm:$0x1]  ;;  %653 = vst [vmem:[#allocation2] sm:$0x1] %v652_v27 }
 0x104   :  { %v413_v36 = vadd.f32 %v412_v32, %v411_v30  ;;  %v1762_v20 = vsub.s32 0, %v1748_v8  ;;  %v655_v29 = vsel %vm1769_vm10, 0, %v654_v26  ;;  %v659_v30 = vld [vmem:[#allocation2 + $0x8] sm:$0x1] }
 0x105   :  { %v429_v37 = vsel %vm408_vm3, %v424_v33, 0.0  ;;  %v414_v38 = vsel %vm408_vm3, %v1732_v34, 0.0  ;;  %v425_v39 = vmul.f32 %v1732_v34, %v1732_v34  ;;  %656 = vst [vmem:[#allocation2 + $0xc] sm:$0x1] %v655_v29  ;;  %v660_v32 = vsel %vm658_vm11, 0, %v659_v30 }
 0x106   :  { %v430_v40 = vadd.f32 %v429_v37, %v428_v35  ;;  %v415_v41 = vadd.f32 %v414_v38, %v413_v36  ;;  %v663_v33 = vsel %vm658_vm11, 0, %v662_v31  ;;  %661 = vst [vmem:[#allocation2 + $0x8] sm:$0x1] %v660_v32  ;;  %v1519_v35 = vmov 0   ;;  %v1498_v36 = vld [vmem:[%s1960_s2] sm:$0xff]   ;;  %v1499_v37 = vld [vmem:[%s1960_s2 + $0x8] sm:$0xff]  }
 0x107   :  { %v431_v42 = vsel %vm408_vm3, %v425_v39, 0.0  ;;  %664 = vst [vmem:[#allocation2 + $0x14] sm:$0x1] %v663_v33  ;;  %908 = vmatprep.subr.bf16.mxu1 %v1519_v35  ;;  %v1500_v38 = vld [vmem:[%s1960_s2 + $0x10] sm:$0xff]   ;;  %v1501_v39 = vld [vmem:[%s1960_s2 + $0x18] sm:$0xff]  }
 0x108   :  { %v416_v43 = vrot.slane %v415_v41, 4  ;;  %v432_v44 = vadd.f32 %v431_v42, %v430_v40  ;;  %909 = vmatpush1.bf16.msra.mxu1 %v1498_v36  ;;  %v1502_v40 = vld [vmem:[%s1960_s2 + $0x20] sm:$0xff]   ;;  %v1504_v42 = vld [vmem:[%s1960_s2 + $0x30] sm:$0xff]  }
 0x109   :  { %910 = vmatprep.subr.bf16.mxu1 %v1519_v35 }
 0x10a   :  { %v417_v45 = vadd.f32 %v416_v43, %v415_v41  ;;  %v433_v46 = vrot.slane %v432_v44, 4  ;;  %v1503_v41 = vld [vmem:[%s1960_s2 + $0x28] sm:$0xff]   ;;  %v1505_v43 = vld [vmem:[%s1960_s2 + $0x38] sm:$0xff]  }
 0x10c   :  { %v418_v47 = vrot.slane %v417_v45, 2  ;;  %v434_v48 = vadd.f32 %v433_v46, %v432_v44  ;;  %911 = vmatpush1.bf16.msra.mxu1 %v1499_v37  ;;  %v1506_v44 = vld [vmem:[%s1960_s2 + $0x40] sm:$0xff]   ;;  %v1508_v46 = vld [vmem:[%s1960_s2 + $0x50] sm:$0xff]   ;;  %v729_v30 = vld [vmem:[#allocation2 + $0xc] sm:$0xf] }
 0x10d   :  { %912 = vmatprep.subr.bf16.mxu1 %v1519_v35 }
 0x10e   :  { %v419_v49 = vadd.f32 %v418_v47, %v417_v45  ;;  %v435_v50 = vrot.slane %v434_v48, 2  ;;  %v1507_v45 = vld [vmem:[%s1960_s2 + $0x48] sm:$0xff]   ;;  %v1509_v47 = vld [vmem:[%s1960_s2 + $0x58] sm:$0xff]   ;;  %v733_v31 = vld [vmem:[#allocation2 + $0x14] sm:$0x1] }
 0x110   :  { %v420_v51 = vrot.slane %v419_v49, 1  ;;  %v436_v52 = vadd.f32 %v435_v50, %v434_v48  ;;  %913 = vmatpush1.bf16.msra.mxu1 %v1500_v38  ;;  %v638_v48 = vsub.s32 1, %v1748_v8 }
 0x111   :  { %914 = vmatprep.subr.bf16.mxu1 %v1519_v35 }
 0x112   :  { %v437_v53 = vrot.slane %v436_v52, 1  ;;  %v421_v54 = vadd.f32 %v420_v51, %v419_v49 }
 0x114   :  { %v438_v55 = vadd.f32 %v437_v53, %v436_v52  ;;  %915 = vmatpush1.bf16.msra.mxu1 %v1501_v39 }
 0x115   :  { %916 = vmatprep.subr.bf16.mxu1 %v1519_v35 }
 0x116   :  { %v440_v56 = vsel %vm439_vm4, %v421_v54, %v438_v55 }
 0x117   :  { %1374 = vmatmul.mubr.msk.f32.vlgmr.msra.gmra.mrb[8].mxu0 %vm408_vm3, %v440_v56 }
 0x118   :  { %1378 = vmatprep.mubr.msk.f32.mxu0 %vm1516_vm2, %v1517_v5  ;;  %1377 = vmatpush3.msk.msra.mxu0 %vm554_vm5, %v405_v57 }
 0x119   :  { %1433 = vmatprep.subr.bf16.mxu0 %v1515_v59  ;;  %917 = vmatpush1.bf16.msra.mxu1 %v1502_v40 }
 0x11a   :  { %918 = vmatprep.subr.bf16.mxu1 %v1519_v35 }
 0x11d   :  { %919 = vmatpush1.bf16.msra.mxu1 %v1503_v41 }
 0x11e   :  { %920 = vmatprep.subr.bf16.mxu1 %v1519_v35 }
 0x121   :  { %921 = vmatpush1.bf16.msra.mxu1 %v1504_v42 }
 0x122   :  { %922 = vmatprep.subr.bf16.mxu1 %v1519_v35 }
 0x125   :  { %923 = vmatpush1.bf16.msra.mxu1 %v1505_v43 }
 0x126   :  { %924 = vmatprep.subr.bf16.mxu1 %v1519_v35 }
 0x129   :  { %925 = vmatpush1.bf16.msra.mxu1 %v1506_v44 }
 0x12a   :  { %926 = vmatprep.subr.bf16.mxu1 %v1519_v35 }
 0x12d   :  { %927 = vmatpush1.bf16.msra.mxu1 %v1507_v45 }
 0x12e   :  { %928 = vmatprep.subr.bf16.mxu1 %v1519_v35 }
 0x131   :  { %929 = vmatpush1.bf16.msra.mxu1 %v1508_v46 }
 0x132   :  { %930 = vmatprep.subr.bf16.mxu1 %v1519_v35 }
 0x135   :  { %931 = vmatpush1.bf16.msra.mxu1 %v1509_v47 }
 0x1ea   :  { %v510_v58 = vpop.f32.mrb[8].mxu0 }
 0x1eb   :  { %v514_v60 = vmul.f32 0.001953125, %v510_v58  ;;  %v1375_v61 = vpop.f32.mrb[9].mxu0 }
 0x1ed   :  { %v515_v62 = vmul.f32 %v514_v60, %v514_v60 }
 0x1ef   :  { %v517_v63 = vrot.slane %v515_v62, 7 }
 0x1f1   :  { %v519_v0 = vsub.f32 %v514_v60, %v517_v63 }
 0x1f3   :  { %v520_v1 = vmax.f32 %v519_v0, 0.0 }
 0x1f5   :  { %v521_v2 = vadd.f32 1e-05, %v520_v1 }
 0x1f7   :  { %1511 = vrsqrt.f32 %v521_v2 }
 0x201   :  { %v1512_v10 = vpop.eup %1511 }
 0x202   :  { %v530_v11 = vrot.slane %v1512_v10, %v1751_v9 }
 0x204   :  { %v531_v12 = vcombine.high %v530_v11, %v530_v11 }
 0x206   :  { %v538_v14 = vrot.slane %v531_v12, %v1751_v9 }
 0x208   :  { %v540_v16 = vmul.f32 %v538_v14, %v406_v13  ;;  %v721_v14 = vld [vmem:[#allocation2] sm:$0xf] }
 0x20a   :  { %v541_v19 = vmul.f32 %v540_v16, %v514_v60 }
 0x20c   :  { %v542_v21 = vsub.f32 %v407_v18, %v541_v19 }
 0x20e   :  { %v547_v22 = vrot.slane %v542_v21, %v1762_v20 }
 0x210   :  { %v549_v23 = vsel %vm439_vm4, %v540_v16, %v547_v22  ;;  %v960_v22 = vld [vmem:[%s1961_s5 + $0x18] sm:$0xff] }
 0x211   :  { %1379 = vmatmul.mubr.msk.f32.vlgmr.msra.gmra.mrb[10].mxu0 %vm550_vm6, %v549_v23  ;;  %v726_v23 = vld [vmem:[#allocation2 + $0x8] sm:$0x1] }
 0x212   :  { %1413 = vmatprep.mubr.msk.f32.mxu0 %vm1516_vm2, %v1517_v5 }
 0x2e4   :  { %v624_v49 = vpop.f32.mrb[10].mxu0 }
 0x2e5   :  { %v631_v50 = vrot.slane %v624_v49, %v1762_v20  ;;  %v1380_v51 = vpop.f32.mrb[11].mxu0  ;;  %v639_v52 = vrot.slane %v624_v49, %v638_v48 }
 0x2e7   :  { %v632_v53 = vmul.f32 %v631_v50, %v1712_v15  ;;  %v633_v54 = vmul.f32 %v631_v50, %v1714_v17  ;;  %v634_v55 = vmul.f32 %v631_v50, %v1725_v28  ;;  %v635_v56 = vmul.f32 %v631_v50, %v1732_v34 }
 0x2e9   :  { %v640_v57 = vadd.f32 %v639_v52, %v632_v53  ;;  %v641_v58 = vadd.f32 %v639_v52, %v633_v54  ;;  %v642_v60 = vadd.f32 %v639_v52, %v634_v55  ;;  %v643_v61 = vadd.f32 %v639_v52, %v635_v56 }
 0x2eb   :  { %v644_v62 = vmax.f32 %v640_v57, 0.0  ;;  %v645_v63 = vmax.f32 %v641_v58, 0.0  ;;  %v646_v0 = vmax.f32 %v642_v60, 0.0  ;;  %v647_v1 = vmax.f32 %v643_v61, 0.0 }
 0x2ed   :  { %v1265_v2 = vpack.c.bf16 %v644_v62, %v644_v62  ;;  %v1266_v3 = vpack.c.bf16 %v645_v63, %v645_v63  ;;  %v1267_v4 = vpack.c.bf16 %v646_v0, %v646_v0  ;;  %v1268_v6 = vpack.c.bf16 %v647_v1, %v647_v1 }
 0x2ef   :  { %v680_v15 = vshrl.u32 %v1265_v2, 16  ;;  %v688_v7 = vshrl.u32 %v1266_v3, 16  ;;  %v697_v17 = vshrl.u32 %v1267_v4, 16  ;;  %v705_v28 = vshrl.u32 %v1268_v6, 16 }
 0x2f0   :  { %v683_v11 = vshll.u32 %v1265_v2, 16  ;;  %v691_v13 = vshll.u32 %v1266_v3, 16  ;;  %v700_v18 = vshll.u32 %v1267_v4, 16  ;;  %v708_v21 = vshll.u32 %v1268_v6, 16  ;;  %v957_v6 = vld [vmem:[%s1961_s5] sm:$0xff] }
 0x2f1   :  { %v682_v10 = vrot.slane %v680_v15, 7  ;;  %v690_v12 = vrot.slane %v688_v7, 7  ;;  %v699_v16 = vrot.slane %v697_v17, 7  ;;  %v707_v19 = vrot.slane %v705_v28, 7  ;;  %v958_v15 = vld [vmem:[%s1961_s5 + $0x8] sm:$0xff] }
 0x2f2   :  { %v1434_v28 = vpack.c.bf16 %v958_v15, %v957_v6 }
 0x2f3   :  { %v685_v25 = vor.u32 %v683_v11, %v682_v10  ;;  %v686_v26 = vrot.slane %v682_v10, 4  ;;  %v693_v27 = vor.u32 %v691_v13, %v690_v12  ;;  %v695_v29 = vrot.slane %v690_v12, 4 }
 0x2f4   :  { %v702_v32 = vor.u32 %v700_v18, %v699_v16  ;;  %v703_v33 = vrot.slane %v699_v16, 4  ;;  %v710_v35 = vor.u32 %v708_v21, %v707_v19  ;;  %v712_v36 = vrot.slane %v707_v19, 4  ;;  %1435 = vmatpush3.bf16.msra.mxu0 %v1434_v28  ;;  %v959_v21 = vld [vmem:[%s1961_s5 + $0x10] sm:$0xff] }
 0x2f5   :  { %v694_v37 = vsel %vm1823_vm14, %v686_v26, %v693_v27  ;;  %v722_v38 = vsel %vm1829_vm15, %v685_v25, %v721_v14  ;;  %v727_v39 = vsel %vm1769_vm10, %v695_v29, %v726_v23  ;;  %1436 = vmatprep.subr.bf16.mxu0 %v1515_v59  ;;  %v1437_v23 = vpack.c.bf16 %v960_v22, %v959_v21  ;;  %v961_v25 = vld [vmem:[%s1961_s5 + $0x20] sm:$0xff]  ;;  %v962_v26 = vld [vmem:[%s1961_s5 + $0x28] sm:$0xff]  ;;  %v963_v29 = vld [vmem:[%s1961_s5 + $0x30] sm:$0xff] }
 0x2f6   :  { %v711_v40 = vsel %vm1823_vm14, %v703_v33, %v710_v35  ;;  %723 = vst [vmem:[#allocation2] sm:$0xf] %v722_v38  ;;  %725 = vst.msk [vmem:[#allocation2 + $0x4] sm:$0xf] %vm719_vm13, %v694_v37  ;;  %v730_v41 = vsel %vm1829_vm15, %v702_v32, %v729_v30  ;;  %v734_v42 = vsel %vm1769_vm10, %v712_v36, %v733_v31  ;;  %v964_v30 = vld [vmem:[%s1961_s5 + $0x38] sm:$0xff]  ;;  %v965_v32 = vld [vmem:[%s1961_s5 + $0x40] sm:$0xff] }
 0x2f7   :  { %728 = vst [vmem:[#allocation2 + $0x8] sm:$0x1] %v727_v39  ;;  %731 = vst [vmem:[#allocation2 + $0xc] sm:$0xf] %v730_v41  ;;  %v1440_v27 = vpack.c.bf16 %v962_v26, %v961_v25  ;;  %v1443_v31 = vpack.c.bf16 %v964_v30, %v963_v29  ;;  %v966_v33 = vld [vmem:[%s1961_s5 + $0x48] sm:$0xff]  ;;  %v967_v36 = vld [vmem:[%s1961_s5 + $0x50] sm:$0xff] }
 0x2f8   :  { %732 = vst.msk [vmem:[#allocation2 + $0x10] sm:$0xf] %vm719_vm13, %v711_v40  ;;  %735 = vst [vmem:[#allocation2 + $0x14] sm:$0x1] %v734_v42  ;;  %1438 = vmatpush3.bf16.msra.mxu0 %v1437_v23  ;;  %v1446_v35 = vpack.c.bf16 %v966_v33, %v965_v32  ;;  %v968_v37 = vld [vmem:[%s1961_s5 + $0x58] sm:$0xff]  ;;  %v969_v39 = vld [vmem:[%s1961_s5 + $0x60] sm:$0xff] }
 0x2f9   :  { %1439 = vmatprep.subr.bf16.mxu0 %v1515_v59  ;;  %v1449_v38 = vpack.c.bf16 %v968_v37, %v967_v36  ;;  %v970_v40 = vld [vmem:[%s1961_s5 + $0x68] sm:$0xff]  ;;  %v971_v42 = vld [vmem:[%s1961_s5 + $0x70] sm:$0xff]  ;;  %v975_v30 = vld [vmem:[%s1964_s10] sm:$0x1] }
 0x2fa   :  { %v1452_v41 = vpack.c.bf16 %v970_v40, %v969_v39 }
 0x2fc   :  { %1441 = vmatpush3.bf16.msra.mxu0 %v1440_v27 }
 0x2fd   :  { %v736_v43 = vld [vmem:[#allocation2] sm:$0xf]  ;;  %v737_v44 = vld [vmem:[#allocation2 + $0x4] sm:$0xf]  ;;  %1442 = vmatprep.subr.bf16.mxu0 %v1515_v59 }
 0x2fe   :  { %v742_v45 = vld [vmem:[#allocation2] sm:$0xe]  ;;  %v1244_v46 = vcombine.low %v736_v43, %v737_v44  ;;  %v1494_v47 = vld [vmem:[#allocation2 + $0x8] ss:$0 sps:$4 sm:$0x11]   ;;  %v972_v43 = vld [vmem:[%s1961_s5 + $0x78] sm:$0xff] }
 0x2ff   :  { %v1248_v49 = vcombine.low %v742_v45, %v737_v44  ;;  %v738_v50 = vld [vmem:[#allocation2 + $0xc] sm:$0xf]  ;;  %v739_v51 = vld [vmem:[#allocation2 + $0x10] sm:$0xf]  ;;  %v795_v52 = vrot.slane %v1494_v47, 1  ;;  %v768_v54 = vshll.u32 %v1494_v47, 16  ;;  %v1455_v44 = vpack.c.bf16 %v972_v43, %v971_v42 }
 0x300   :  { %v763_v53 = vshll.u32 %v1244_v46, 16  ;;  %v743_v55 = vld [vmem:[#allocation2 + $0xc] sm:$0xe]  ;;  %v1245_v57 = vcombine.low %v738_v50, %v739_v51  ;;  %v1497_v24 = vld [vmem:[#allocation2 + $0x14] ss:$0 sps:$4 sm:$0x11]   ;;  %1444 = vmatpush3.bf16.msra.mxu0 %v1443_v31 }
 0x301   :  { %v794_v56 = vrot.slane %v1248_v49, 1  ;;  %v1249_v58 = vcombine.low %v743_v55, %v739_v51  ;;  %v761_v60 = vshrl.u32 %v1244_v46, 16  ;;  %v770_v63 = vrot.slane %v768_v54, 1  ;;  %1445 = vmatprep.subr.bf16.mxu0 %v1515_v59 }
 0x302   :  { %v765_v61 = vrot.slane %v763_v53, 1  ;;  %v775_v0 = vshll.u32 %v1245_v57, 16  ;;  %v780_v2 = vshll.u32 %v1497_v24, 16  ;;  %v798_v4 = vrot.slane %v1497_v24, 1 }
 0x303   :  { %v796_v62 = vsel %vm98_vm0, %v794_v56, %v795_v52  ;;  %v797_v3 = vrot.slane %v1249_v58, 1  ;;  %v773_v7 = vshrl.u32 %v1245_v57, 16 }
 0x304   :  { %1262 = vmatprep.mubr.msk.bf16.mxu1 %vm408_vm3, %v796_v62  ;;  %v766_v1 = vor.u32 %v765_v61, %v761_v60  ;;  %v777_v17 = vrot.slane %v775_v0, 1  ;;  %v782_v12 = vrot.slane %v780_v2, 1  ;;  %1447 = vmatpush3.bf16.msra.mxu0 %v1446_v35 }
 0x305   :  { %v799_v10 = vsel %vm98_vm0, %v797_v3, %v798_v4  ;;  %1448 = vmatprep.subr.bf16.mxu0 %v1515_v59  ;;  %vm1105_vm0 = vcmask 64512  }
 0x306   :  { %v771_v34 = vsel %vm65_vm1, %v766_v1, %v770_v63  ;;  %v778_v11 = vor.u32 %v777_v17, %v773_v7 }
 0x307   :  { %784 = vrot.lane.b32.xlu0 %v771_v34, %s1520_s22 }
 0x308   :  { %v783_v13 = vsel %vm65_vm1, %v778_v11, %v782_v12  ;;  %1450 = vmatpush3.bf16.msra.mxu0 %v1449_v38  ;;  %v973_v11 = vld [vmem:[%s1962_s6] sm:$0xff] }
 0x309   :  { %1451 = vmatprep.subr.bf16.mxu0 %v1515_v59 }
 0x30b   :  { %786 = vrot.lane.b32.xlu0 %v783_v13, %s1520_s22 }
 0x30c   :  { %1453 = vmatpush3.bf16.msra.mxu0 %v1452_v41 }
 0x30d   :  { %1454 = vmatprep.subr.bf16.mxu0 %v1515_v59 }
 0x310   :  { %1456 = vmatpush3.bf16.msra.mxu0 %v1455_v44 }
 0x311   :  { %1416 = vmatprep.subr.mxu0 %v1517_v5 }
 0x379   :  { %v785_v14 = vpop.permute.xlu0 %784 }
 0x37a   :  { %v801_v16 = vsel %vm408_vm3, %v1244_v46, %v785_v14 }
 0x37b   :  { %941 = vmatmul.mubr.bf16.vlgmr.msra.gmra.mrb[4].mxu1 %v801_v16 }
 0x37c   :  { %1263 = vmatprep.mubr.msk.bf16.mxu1 %vm408_vm3, %v799_v10 }
 0x37d   :  { %v787_v18 = vpop.permute.xlu0 %786 }
 0x37e   :  { %v804_v19 = vsel %vm408_vm3, %v1245_v57, %v787_v18 }
 0x383   :  { %949 = vmatmul.mubr.bf16.gmra.mrb[8].mxu1 %v804_v19 }
 0x44e   :  { %v1911_v45 = vpop.f32.mrb[4].mxu1 }
 0x44f   :  { %v944_v46 = vpop.f32.mrb[5].mxu1  ;;  %v985_v49 = vmul.f32 %v1911_v45, %v1911_v45 }
 0x450   :  { %v1913_v47 = vpop.f32.mrb[6].mxu1 }
 0x451   :  { %v976_v50 = vadd.f32 %v1913_v47, %v1911_v45  ;;  %v986_v51 = vmul.f32 %v1913_v47, %v1913_v47  ;;  %v947_v52 = vpop.f32.mrb[7].mxu1 }
 0x453   :  { %v989_v53 = vadd.f32 %v986_v51, %v985_v49 }
 0x456   :  { %v950_v59 = vpop.f32.mrb[8].mxu1 }
 0x457   :  { %v977_v54 = vadd.f32 %v976_v50, %v950_v59  ;;  %v987_v55 = vmul.f32 %v950_v59, %v950_v59  ;;  %v952_v56 = vpop.f32.mrb[9].mxu1 }
 0x458   :  { %v953_v57 = vpop.f32.mrb[10].mxu1 }
 0x459   :  { %v990_v24 = vadd.f32 %v989_v53, %v987_v55  ;;  %v978_v58 = vadd.f32 %v977_v54, %v953_v57  ;;  %v988_v60 = vmul.f32 %v953_v57, %v953_v57  ;;  %v955_v61 = vpop.f32.mrb[11].mxu1 }
 0x45b   :  { %v979_v62 = vrot.slane %v978_v58, 4  ;;  %v991_v63 = vadd.f32 %v990_v24, %v988_v60 }
 0x45d   :  { %v980_v0 = vadd.f32 %v979_v62, %v978_v58  ;;  %v992_v1 = vrot.slane %v991_v63, 4 }
 0x45f   :  { %v981_v2 = vrot.slane %v980_v0, 2  ;;  %v993_v3 = vadd.f32 %v992_v1, %v991_v63 }
 0x461   :  { %v982_v4 = vadd.f32 %v981_v2, %v980_v0  ;;  %v994_v6 = vrot.slane %v993_v3, 2 }
 0x463   :  { %v983_v15 = vrot.slane %v982_v4, 1  ;;  %v995_v7 = vadd.f32 %v994_v6, %v993_v3 }
 0x465   :  { %v996_v17 = vrot.slane %v995_v7, 1  ;;  %v984_v28 = vadd.f32 %v983_v15, %v982_v4 }
 0x467   :  { %v997_v34 = vadd.f32 %v996_v17, %v995_v7 }
 0x469   :  { %v998_v10 = vsel %vm439_vm4, %v984_v28, %v997_v34 }
 0x46a   :  { %1414 = vmatmul.mubr.f32.vlgmr.msra.gmra.mrb[12].mxu0 %v998_v10 }
 0x46b   :  { %1418 = vmatprep.mubr.msk.f32.mxu0 %vm1516_vm2, %v1517_v5  ;;  %1417 = vmatpush3.msra.mxu0 %v973_v11  ;;  %v974_v5 = vld [vmem:[%s1963_s9] sm:$0x1] }
 0x53d   :  { %v1065_v12 = vpop.f32.mrb[12].mxu0 }
 0x53e   :  { %v1069_v13 = vmul.f32 0.001953125, %v1065_v12  ;;  %v1415_v14 = vpop.f32.mrb[13].mxu0 }
 0x540   :  { %v1070_v16 = vmul.f32 %v1069_v13, %v1069_v13 }
 0x542   :  { %v1072_v18 = vrot.slane %v1070_v16, 7 }
 0x544   :  { %v1074_v19 = vsub.f32 %v1069_v13, %v1072_v18 }
 0x546   :  { %v1075_v21 = vmax.f32 %v1074_v19, 0.0 }
 0x548   :  { %v1076_v22 = vadd.f32 1e-05, %v1075_v21 }
 0x54a   :  { %1513 = vrsqrt.f32 %v1076_v22 }
 0x554   :  { %v1514_v23 = vpop.eup %1513 }
 0x555   :  { %v1085_v25 = vrot.slane %v1514_v23, %v1751_v9 }
 0x557   :  { %v1086_v26 = vcombine.high %v1085_v25, %v1085_v25 }
 0x559   :  { %v1093_v27 = vrot.slane %v1086_v26, %v1751_v9 }
 0x55b   :  { %v1095_v29 = vmul.f32 %v1093_v27, %v974_v5 }
 0x55d   :  { %v1096_v31 = vmul.f32 %v1095_v29, %v1069_v13 }
 0x55f   :  { %v1097_v32 = vsub.f32 %v975_v30, %v1096_v31 }
 0x561   :  { %v1102_v33 = vrot.slane %v1097_v32, %v1762_v20 }
 0x563   :  { %v1104_v35 = vsel %vm439_vm4, %v1095_v29, %v1102_v33 }
 0x564   :  { %1419 = vmatmul.mubr.msk.f32.vlgmr.msra.gmra.mrb[14].mxu0 %vm1105_vm0, %v1104_v35 }
 0x637   :  { %v1175_v36 = vpop.f32.mrb[14].mxu0 }
 0x638   :  { %v1182_v37 = vrot.slane %v1175_v36, %v1762_v20  ;;  %v1420_v38 = vpop.f32.mrb[15].mxu0  ;;  %v1190_v9 = vrot.slane %v1175_v36, %v638_v48 }
 0x63a   :  { %v1183_v39 = vmul.f32 %v1182_v37, %v1911_v45  ;;  %v1184_v40 = vmul.f32 %v1182_v37, %v1913_v47  ;;  %v1185_v41 = vmul.f32 %v1182_v37, %v950_v59  ;;  %v1186_v42 = vmul.f32 %v1182_v37, %v953_v57 }
 0x63c   :  { %v1191_v43 = vadd.f32 %v1190_v9, %v1183_v39  ;;  %v1192_v44 = vadd.f32 %v1190_v9, %v1184_v40  ;;  %v1193_v46 = vadd.f32 %v1190_v9, %v1185_v41  ;;  %v1194_v49 = vadd.f32 %v1190_v9, %v1186_v42 }
 0x63e   :  { %v1195_v50 = vmax.f32 %v1191_v43, 0.0  ;;  %v1196_v51 = vmax.f32 %v1192_v44, 0.0  ;;  %v1197_v52 = vmax.f32 %v1193_v46, 0.0  ;;  %v1198_v53 = vmax.f32 %v1194_v49, 0.0 }
 0x640   :  { %1199 = vst [vmem:[%s1965_s11] sm:$0xff] %v1195_v50  ;;  %1200 = vst [vmem:[%s1965_s11 + $0x8] sm:$0xff] %v1196_v51 }
 0x641   :  { %1201 = vst [vmem:[%s1965_s11 + $0x10] sm:$0xff] %v1197_v52  ;;  %1202 = vst [vmem:[%s1965_s11 + $0x18] sm:$0xff] %v1198_v53 }

</bundles_post_ra>
